<compile_context>
chip_gen: v7x
topology: tpu7x:2x2x1
jax: 0.10.0
libtpu: 0.0.40
codegen_flags: <defaults>
</compile_context>

<pallas_src>
import math

import jax
import jax.numpy as jnp
from jax.experimental import pallas as pl
from jax.experimental.pallas import tpu as pltpu


# ---------------------------------------------------------------------------
# Table construction (matches the PyTorch buffer `embeds`, shape (1, C, S)).
# ---------------------------------------------------------------------------
def make_pos_embeds(channels: int, max_seq_length: int, theta: float = 10000.0,
                    dtype=jnp.float32):
    """Deterministic recreation of the PyTorch buffer `embeds` (1, C, S),
    built once in the activation dtype so the broadcast table moves the
    minimum number of HBM bytes at run time."""
    if channels % 2 != 0:
        channels += 1  # same behavior as the module
    position = jnp.arange(0, max_seq_length, dtype=jnp.float32)[None, :]          # (1, S)
    div_term = jnp.exp(
        jnp.arange(0, channels, 2, dtype=jnp.float32) * -(math.log(theta) / channels)
    )[:, None]                                                                     # (C/2, 1)
    sin_part = jnp.sin(div_term * position)                                        # (C/2, S)
    cos_part = jnp.cos(div_term * position)                                        # (C/2, S)
    embeds = jnp.zeros((channels, max_seq_length), dtype=jnp.float32)
    embeds = embeds.at[0::2, :].set(sin_part)
    embeds = embeds.at[1::2, :].set(cos_part)
    return embeds[None, :, :].astype(dtype)                                        # (1, C, S)


# ---------------------------------------------------------------------------
# Kernel body: (TBb, TC, TS) + (1, TC, TS) -> (TBb, TC, TS)  (VPU add only).
# ---------------------------------------------------------------------------
def _add_kernel(x_ref, e_ref, o_ref):
    o_ref[...] = (x_ref[...] + e_ref[...]).astype(o_ref.dtype)


# ---------------------------------------------------------------------------
# Tiling helpers.
# ---------------------------------------------------------------------------
_TARGET_BLOCK_BYTES = 2 * 1024 * 1024    # ~2 MiB/operand block (roofline knee)
_S_CAP = 2048                            # lane-dim cap (multiple of 128)
_C_CAP = 512                             # sublane-dim cap


def _sublane_unit(dtype) -> int:
    """Dtype-aware sublane packing unit: 8 (f32), 16 (bf16), 32 (int8/fp8)."""
    return max(8, 32 // jnp.dtype(dtype).itemsize)


def _pick_tile(n_x, n_tab, unit, cap):
    """Block extent along one dim, legal for BOTH the activation (extent n_x)
    and the embedding table (extent n_tab): either a multiple of `unit`
    (hardware tile) or equal to the array's full extent.  Returns None if no
    tile <= cap works (caller then slices the table so extents match)."""
    if n_x == n_tab and n_x <= cap:
        return n_x                       # full extent for both arrays
    t = min(n_x, cap)
    t -= t % unit
    return t if t > 0 else None


def _is_concrete(x) -> bool:
    try:
        return not isinstance(x, jax.core.Tracer)
    except AttributeError:               # jax.core.Tracer moved/removed
        return True


def _prepare_table(cache, embeds, C, S, dtype):
    """One-off table preparation (dtype cast and/or (C, S) slice), cached per
    (C, S, dtype) so the hot path never re-pays an HBM round trip for it."""
    key = (C, S, jnp.dtype(dtype).name)
    if cache is not None and key in cache:
        return cache[key]
    t = embeds
    if C is not None:
        t = t[:, :C, :S]
    if t.dtype != dtype:
        t = t.astype(dtype)
    if cache is not None and _is_concrete(t):
        cache[key] = t
    return t


# ---------------------------------------------------------------------------
# Forward.
# ---------------------------------------------------------------------------
def attn_pos_embeds_forward(flat_enc: jax.Array, embeds: jax.Array, *,
                            slice_cache=None, donate_input: bool = False) -> jax.Array:
    """flat_enc: (B, C, S); embeds: (1, C_max, S_max).
    Returns flat_enc + embeds[:, :C, :S]."""
    B, C, S = flat_enc.shape
    _, C_max, S_max = embeds.shape
    assert C <= C_max and S <= S_max, "flat_enc exceeds the positional table"

    dtype = flat_enc.dtype
    itemsize = jnp.dtype(dtype).itemsize
    unit_c = _sublane_unit(dtype)

    table = embeds
    if table.dtype != dtype:
        # Ideally the table is already built in this dtype at init; this is a
        # cached fallback, paid once per dtype.
        table = _prepare_table(slice_cache, embeds, None, None, dtype)

    # ---- Choose blocks legal for BOTH x (extent C/S) and the full table
    # (extent C_max/S_max), so the constant table never needs a slice copy.
    TS = _pick_tile(S, S_max, 128, _S_CAP)
    TC = None
    if TS is not None:
        tc_cap = max(unit_c, min(_C_CAP, _TARGET_BLOCK_BYTES // (TS * itemsize)))
        TC = _pick_tile(C, C_max, unit_c, tc_cap)

    if TS is None or TC is None:
        # Irregular extent (< hardware tile and != table extent): slice the
        # table once (cached) so full-extent blocks become legal for both.
        table = _prepare_table(slice_cache, embeds, C, S, dtype)
        TS = _pick_tile(S, S, 128, _S_CAP)
        tc_cap = max(unit_c, min(_C_CAP, _TARGET_BLOCK_BYTES // (TS * itemsize)))
        TC = _pick_tile(C, C, unit_c, tc_cap)

    # Fold batch rows per grid step so each x/out block is ~_TARGET_BLOCK_BYTES
    # (amortizes the ~0.35 us/step overhead when C*S per block is small).
    TBb = int(min(B, max(1, _TARGET_BLOCK_BYTES // (TC * TS * itemsize))))

    nb, nc, ns = pl.cdiv(B, TBb), pl.cdiv(C, TC), pl.cdiv(S, TS)

    cost = pl.CostEstimate(
        flops=B * C * S,
        transcendentals=0,
        bytes_accessed=(2 * B * C * S + C * S) * itemsize,
    )

    return pl.pallas_call(
        _add_kernel,
        out_shape=jax.ShapeDtypeStruct((B, C, S), dtype),
        grid_spec=pltpu.PrefetchScalarGridSpec(
            num_scalar_prefetch=0,
            grid=(nb, nc, ns),           # batch-blocks outermost (v7x megacore)
            in_specs=[
                pl.BlockSpec((TBb, TC, TS), lambda b, c, s: (b, c, s)),
                # Full (or cached-sliced) table: index_map only touches its
                # first C/S tiles, which match embeds[:, :C, :S] exactly.
                pl.BlockSpec((1, TC, TS), lambda b, c, s: (0, c, s)),
            ],
            out_specs=pl.BlockSpec((TBb, TC, TS), lambda b, c, s: (b, c, s)),
        ),
        compiler_params=pltpu.CompilerParams(
            dimension_semantics=("parallel", "parallel", "parallel"),
            vmem_limit_bytes=32 * 1024 * 1024,
        ),
        cost_estimate=cost,
        input_output_aliases={0: 0} if donate_input else {},
    )(flat_enc, table)


class AttnPosEmbeds:
    """JAX/Pallas port of the PyTorch module.  The positional table is built
    once at init (in the activation dtype); any fallback slices / casts are
    cached so the per-call hot path is a single Pallas streaming add."""

    def __init__(self, channels: int, max_seq_length: int, theta: float = 10000.0,
                 dtype=jnp.float32):
        self.embeds = make_pos_embeds(channels, max_seq_length, theta, dtype)
        self._slice_cache = {}

    def __call__(self, flat_enc: jax.Array, *, donate_input: bool = False) -> jax.Array:
        return attn_pos_embeds_forward(flat_enc, self.embeds,
                                       slice_cache=self._slice_cache,
                                       donate_input=donate_input)


if __name__ == "__main__":
    key = jax.random.PRNGKey(0)
    k1, k2, k3 = jax.random.split(key, 3)

    # Case 1 (module demo sizes): S < 128 and S != S_max -> cached table slice,
    # full-extent (C, S) blocks, batch folded into one grid step.
    mod1 = AttnPosEmbeds(channels=8, max_seq_length=32)           # embeds (1, 8, 32)
    B, C, S = 2, 8, 16
    x1 = jax.random.normal(k1, (B, C, S), dtype=jnp.float32)
    out1 = jax.block_until_ready(mod1(x1))
    ref1 = x1 + mod1.embeds[:, :C, :S]
    assert out1.shape == (B, C, S)
    assert jnp.allclose(out1, ref1, atol=1e-6), "mismatch vs reference (case 1)"

    # Case 2: S >= 128, C < C_max, S < S_max -> reads the FULL table directly
    # through the index_map (no slice copy), batch folded per grid step.
    mod2 = AttnPosEmbeds(channels=12, max_seq_length=160)         # embeds (1, 12, 160)
    B2, C2, S2 = 2, 8, 128
    x2 = jax.random.normal(k2, (B2, C2, S2), dtype=jnp.float32)
    out2 = jax.block_until_ready(mod2(x2))
    ref2 = x2 + mod2.embeds[:, :C2, :S2]
    assert out2.shape == (B2, C2, S2)
    assert jnp.allclose(out2, ref2, atol=1e-6), "mismatch vs reference (case 2)"

    # Case 3: non-divisible S (200 over TS=128) -> masked edge blocks that read
    # table columns beyond S; they only land in masked output positions.
    mod3 = AttnPosEmbeds(channels=16, max_seq_length=256)         # embeds (1, 16, 256)
    B3, C3, S3 = 2, 16, 200
    x3 = jax.random.normal(k3, (B3, C3, S3), dtype=jnp.float32)
    out3 = jax.block_until_ready(mod3(x3))
    ref3 = x3 + mod3.embeds[:, :C3, :S3]
    assert out3.shape == (B3, C3, S3)
    assert jnp.allclose(out3, ref3, atol=1e-6), "mismatch vs reference (case 3)"

    print("KERNEL_OK")
</pallas_src>

<mosaic_0001>
module attributes {stable_mosaic.version = 11 : i64} {
  func.func @_add_kernel(%arg0: i32, %arg1: i32, %arg2: i32, %arg3: memref<2x8x16xf32, #tpu.memory_space<vmem>>, %arg4: memref<1x8x16xf32, #tpu.memory_space<vmem>>, %arg5: memref<2x8x16xf32, #tpu.memory_space<vmem>>) attributes {dimension_semantics = [#tpu.dimension_semantics<parallel>, #tpu.dimension_semantics<parallel>, #tpu.dimension_semantics<parallel>], iteration_bounds = array<i64: 1, 1, 1>, scalar_prefetch = 0 : i64, scratch_operands = 0 : i64, tpu.core_type = #tpu.core_type<tc>, window_params = [{transform_indices = @transform_0, window_bounds = array<i64: 2, 8, 16>}, {transform_indices = @transform_1, window_bounds = array<i64: 1, 8, 16>}, {transform_indices = @transform_2, window_bounds = array<i64: 2, 8, 16>}]} {
    %c0 = arith.constant 0 : index
    %c0_0 = arith.constant 0 : index
    %c0_1 = arith.constant 0 : index
    %0 = vector.load %arg3[%c0, %c0_0, %c0_1] : memref<2x8x16xf32, #tpu.memory_space<vmem>>, vector<2x8x16xf32>
    %c0_2 = arith.constant 0 : index
    %c0_3 = arith.constant 0 : index
    %c0_4 = arith.constant 0 : index
    %1 = vector.load %arg4[%c0_2, %c0_3, %c0_4] : memref<1x8x16xf32, #tpu.memory_space<vmem>>, vector<1x8x16xf32>
    %2 = vector.broadcast %1 : vector<1x8x16xf32> to vector<2x8x16xf32>
    %3 = arith.addf %0, %2 : vector<2x8x16xf32>
    %c0_5 = arith.constant 0 : index
    %c0_6 = arith.constant 0 : index
    %c0_7 = arith.constant 0 : index
    %4 = vector.load %arg5[%c0_5, %c0_6, %c0_7] : memref<2x8x16xf32, #tpu.memory_space<vmem>>, vector<2x8x16xf32>
    tpu.vector_store %arg5[%c0_5, %c0_6, %c0_7], %3 {strides = array<i32>} : memref<2x8x16xf32, #tpu.memory_space<vmem>>, vector<2x8x16xf32>,
    return
  }
  func.func @transform_0(%arg0: i32, %arg1: i32, %arg2: i32) -> (i32, i32, i32) {
    %c0_i32 = arith.constant 0 : i32
    return %arg0, %arg1, %arg2 : i32, i32, i32
  }
  func.func @transform_1(%arg0: i32, %arg1: i32, %arg2: i32) -> (i32, i32, i32) {
    %c0_i32 = arith.constant 0 : i32
    %c0_i32_0 = arith.constant 0 : i32
    return %c0_i32, %arg1, %arg2 : i32, i32, i32
  }
  func.func @transform_2(%arg0: i32, %arg1: i32, %arg2: i32) -> (i32, i32, i32) {
    %c0_i32 = arith.constant 0 : i32
    return %arg0, %arg1, %arg2 : i32, i32, i32
  }
}

</mosaic_0001>

<bundles_post_ra>
// kernel: tpu_custom_call.1
= control target key start
LH: loop header
LB: loop body
LE: loop exit
PB: predicated region body
PF: predicated region fallthrough
CT: control target
= control target key end

     0   :  { %7 = vsyncpa [#allocation3], 0  ;;  %s203_s0 = inlined_call_operand.hbm [shape: f32[2,8,16], index: 0, kind: input, shape index: {}]   ;;  %s204_s1 = inlined_call_operand.hbm [shape: f32[1,8,16], index: 1, kind: input, shape index: {}]   ;;  %s205_s2 = inlined_call_operand.hbm [shape: f32[2,8,16], index: 2, kind: output, shape index: {}]  }
   0x1   :  { %8 = vsyncpa [#allocation6], 0 }
   0x2   :  { %9 = vsyncpa [#allocation4], 0  ;;  %s141_s9 = smov [#allocation2]   ;;  %s69_s13 = scalar_lea.hbm %s203_s0, 256 }
   0x3   :  { %s15_s10 = sshll.u32 %s141_s9, 4  ;;  %p70_p0 = scmp.ne.s32.totalorder %s203_s0, %s69_s13  ;;  %s16_s10 = int_to_ptr.vmem [resolvable:$true] %s15_s10 }
   0x4   :  { %p73_p1 = scmp.lt.u32.totalorder %s69_s13, %s203_s0 }
   0x6   :  { %p75_p2 = pnand %p73_p1, %p70_p0 }
   0x8   :  { %78 = shalt.err (!%p75_p2)
}
   0x9   :  { %s79_s18 = scalar_lea.vmem %s16_s10, 256  ;;  %p84_p4 = scmp.lt.s32.totalorder %s16_s10, %s16_s10 }
   0xa   :  { %p80_p3 = scmp.ne.s32.totalorder %s16_s10, %s79_s18  ;;  %p85_p5 = scmp.lt.s32.totalorder %s79_s18, %s79_s18 }
   0xc   :  { %p86_p6 = por %p85_p5, %p84_p4 }
   0xe   :  { %p87_p7 = pnand %p86_p6, %p80_p3 }
  0x10   :  { %90 = shalt.err (!%p87_p7)
}
  0x11   :  { %s142_s19 = smov 128   ;;  %s143_s20 = smov 8  }
  0x12   :  { %21 = dma.hbm_to_vmem [thread:$0]  %s203_s0, 256, %s16_s10, [#allocation3], %s142_s19, %s142_s19, %s143_s20  }
  0x13   :  { %s144_s23 = smov [#allocation5]   ;;  %s91_s27 = scalar_lea.hbm %s204_s1, 128 }
  0x14   :  { %s28_s24 = sshll.u32 %s144_s23, 4  ;;  %p92_p8 = scmp.ne.s32.totalorder %s204_s1, %s91_s27  ;;  %s29_s24 = int_to_ptr.vmem [resolvable:$true] %s28_s24 }
  0x15   :  { %p95_p9 = scmp.lt.u32.totalorder %s91_s27, %s204_s1 }
  0x17   :  { %p97_p10 = pnand %p95_p9, %p92_p8 }
  0x19   :  { %100 = shalt.err (!%p97_p10)
}
  0x1a   :  { %s101_s4 = scalar_lea.vmem %s29_s24, 128  ;;  %p106_p12 = scmp.lt.s32.totalorder %s29_s24, %s29_s24 }
  0x1b   :  { %p102_p11 = scmp.ne.s32.totalorder %s29_s24, %s101_s4  ;;  %p107_p13 = scmp.lt.s32.totalorder %s101_s4, %s101_s4 }
  0x1d   :  { %p108_p0 = por %p107_p13, %p106_p12 }
  0x1f   :  { %p109_p1 = pnand %p108_p0, %p102_p11 }
  0x21   :  { %112 = shalt.err (!%p109_p1)
}
  0x22   :  { %31 = dma.hbm_to_vmem [thread:$0]  %s204_s1, 128, %s29_s24, [#allocation6]  }
  0x23   :  { %135 = dma.done.wait [#allocation3], 256  }
  0x24   :  { %136 = vsyncadd [#allocation3], 4294967040 }
  0x25   :  { %137 = dma.done.wait [#allocation6], 128  }
  0x26   :  { %138 = vsyncadd [#allocation6], 4294967168  ;;  %s145_s6 = smov [#allocation7]   ;;  %v38_v0 = vld [vmem:[#allocation2] sm:$0xff]  ;;  %v40_v1 = vld [vmem:[#allocation5] sm:$0xff]  ;;  %vm43_vm0 = vcmask 130048  }
  0x27   :  { %s51_s7 = sshll.u32 %s145_s6, 4  ;;  %v39_v2 = vld [vmem:[#allocation2 + $0x8] sm:$0xff]  ;;  %v41_v3 = vadd.f32 %v40_v1, %v38_v0  ;;  %s52_s7 = int_to_ptr.vmem [resolvable:$true] %s51_s7 }
  0x28   :  { %v42_v4 = vadd.f32 %v40_v1, %v39_v2  ;;  %s113_s8 = scalar_lea.vmem %s52_s7, 256  ;;  %p118_p3 = scmp.lt.s32.totalorder %s52_s7, %s52_s7 }
  0x29   :  { %44 = vst.msk [vmem:[#allocation7] sm:$0xff] %vm43_vm0, %v41_v3  ;;  %p114_p2 = scmp.ne.s32.totalorder %s52_s7, %s113_s8  ;;  %p119_p4 = scmp.lt.s32.totalorder %s113_s8, %s113_s8 }
  0x2a   :  { %45 = vst.msk [vmem:[#allocation7 + $0x8] sm:$0xff] %vm43_vm0, %v42_v4 }
  0x2b   :  { %p120_p5 = por %p119_p4, %p118_p3 }
  0x2d   :  { %p121_p6 = pnand %p120_p5, %p114_p2 }
  0x2f   :  { %124 = shalt.err (!%p121_p6)
}
  0x30   :  { %s125_s10 = scalar_lea.hbm %s205_s2, 256 }
  0x31   :  { %p126_p7 = scmp.ne.s32.totalorder %s205_s2, %s125_s10  ;;  %p129_p8 = scmp.lt.u32.totalorder %s125_s10, %s205_s2 }
  0x33   :  { %p131_p9 = pnand %p129_p8, %p126_p7 }
  0x35   :  { %134 = shalt.err (!%p131_p9)
}
  0x36   :  { %57 = dma.vmem_to_hbm [thread:$0]  %s52_s7, 256, %s205_s2, [#allocation4], %s142_s19, %s142_s19, %s143_s20  }
  0x37   :  { %139 = dma.done.wait [#allocation4], 256  }
  0x38   :  { %140 = vsyncadd [#allocation4], 4294967040 }
  0x39   :  { %61 = vsyncpa [#allocation3], 1 }
  0x3a   :  { %62 = vsyncpa [#allocation6], 1 }
  0x3b   :  { %63 = vsyncpa [#allocation4], 1 }

</bundles_post_ra>
